<compile_context>
chip_gen: v6e
topology: v6e:2x2x1
jax: 0.10.0
libtpu: 0.0.40
codegen_flags: <defaults>
</compile_context>

<pallas_src>
from functools import lru_cache, partial
from typing import NamedTuple

import numpy as np
import jax
import jax.numpy as jnp
from jax.experimental import pallas as pl
from jax.experimental.pallas import tpu as pltpu

_LANE = 128
_SUBLANE = 8


def _round_up(n, m):
    return ((n + m - 1) // m) * m


def _ceil_div(a, b):
    return -(-a // b)


def _vmem_budget_bytes():
    # Probe once at import time (review: no per-call feature probes / device syncs).
    try:
        cap = int(pltpu.get_tpu_info().vmem_capacity_bytes)
    except Exception:
        cap = 64 * 1024 * 1024                    # conservative (v7x-sized) default
    # ~100 MiB on 128 MiB parts (v5e/v6e), ~50 MiB on 64 MiB parts (v7x).
    return max(32 * 1024 * 1024, min(int(cap * 0.78), cap - 8 * 1024 * 1024))


_VMEM_BUDGET = _vmem_budget_bytes()


# --------------------------------------------------------------------------------------
# DFT matrices (host-cached float64 -> device-cached per dtype)
# --------------------------------------------------------------------------------------
@lru_cache(maxsize=None)
def _dft_matrices_np(T, Tp, Fp):
    """Real rfft / irfft matrices, zero-padded to (Tp, Fp) / (Fp, Tp)."""
    Fdim = T // 2 + 1
    t = np.arange(T, dtype=np.float64)[:, None]
    f = np.arange(Fdim, dtype=np.float64)[None, :]
    ang = 2.0 * np.pi * t * f / T
    fwd_cos = np.cos(ang)                          # Xr = X @ fwd_cos
    fwd_nsin = -np.sin(ang)                        # Xi = X @ fwd_nsin
    w = np.full((Fdim,), 2.0)
    w[0] = 1.0
    if T % 2 == 0:
        w[-1] = 1.0                                # DC / Nyquist weights
    angi = 2.0 * np.pi * np.arange(Fdim)[:, None] * np.arange(T)[None, :] / T
    inv_cos = (w[:, None] / T) * np.cos(angi)      # y += Zr @ inv_cos
    inv_nsin = -(w[:, None] / T) * np.sin(angi)    # y += Zi @ inv_nsin

    def pad(m, rows, cols):
        out = np.zeros((rows, cols), np.float64)
        out[:m.shape[0], :m.shape[1]] = m
        return out

    return (pad(fwd_cos, Tp, Fp), pad(fwd_nsin, Tp, Fp),
            pad(inv_cos, Fp, Tp), pad(inv_nsin, Fp, Tp))


_DEVICE_MAT_CACHE = {}


def _dft_matrices_dev(T, Tp, Fp, dtype):
    dt = np.dtype(dtype)
    key = (T, Tp, Fp, dt.name)
    if key not in _DEVICE_MAT_CACHE:
        mats = _dft_matrices_np(T, Tp, Fp)
        _DEVICE_MAT_CACHE[key] = tuple(jnp.asarray(m, dt) for m in mats)
    return _DEVICE_MAT_CACHE[key]


# --------------------------------------------------------------------------------------
# Kernels
# --------------------------------------------------------------------------------------
def _folded_kernel(x_ref, gr_ref, gi_ref, icos_ref, insin_ref, o_ref):
    """Filters folded into the forward DFT: pure matmuls, no pointwise epilogue."""
    f = pl.program_id(1)
    mm = icos_ref.dtype
    X = x_ref[...]                                                        # (Bt, C*Tp)
    Zr = jnp.dot(X, gr_ref[...], preferred_element_type=jnp.float32)     # (Bt, tF)
    Zi = jnp.dot(X, gi_ref[...], preferred_element_type=jnp.float32)
    y = (jnp.dot(Zr.astype(mm), icos_ref[...], preferred_element_type=jnp.float32)
         + jnp.dot(Zi.astype(mm), insin_ref[...], preferred_element_type=jnp.float32))

    @pl.when(f == 0)
    def _():
        o_ref[...] = y                                                    # (Bt, Tp) dense

    @pl.when(f != 0)
    def _():
        o_ref[...] += y
    # TODO(synk): nn.Dropout(p=0.75) is identity in eval mode; train-mode RNG dropout
    # is intentionally not reproduced.


def _general_kernel(x_ref, fcos_ref, fnsin_ref, wre_ref, wie_ref,
                    icos_ref, insin_ref, o_ref):
    """Separate filters (large C): static channel loop on lane-aligned 2-D slices."""
    f = pl.program_id(1)
    C = wre_ref.shape[0]
    tp = icos_ref.shape[1]
    bt = x_ref.shape[0]
    tf = fcos_ref.shape[1]
    mm = icos_ref.dtype
    acc_r = jnp.zeros((bt, tf), jnp.float32)
    acc_i = jnp.zeros((bt, tf), jnp.float32)
    for c in range(C):                            # static unroll; no 3-D reshapes
        Xc = x_ref[:, c * tp:(c + 1) * tp]        # lane-aligned (Bt, Tp) slice
        Xr = jnp.dot(Xc, fcos_ref[...], preferred_element_type=jnp.float32)
        Xi = jnp.dot(Xc, fnsin_ref[...], preferred_element_type=jnp.float32)
        wr_c = wre_ref[c:c + 1, :]                # (1, tF) f32 (v5e VPU has no bf16)
        wi_c = wie_ref[c:c + 1, :]
        acc_r = acc_r + (Xr * wr_c - Xi * wi_c)
        acc_i = acc_i + (Xr * wi_c + Xi * wr_c)
    y = (jnp.dot(acc_r.astype(mm), icos_ref[...], preferred_element_type=jnp.float32)
         + jnp.dot(acc_i.astype(mm), insin_ref[...], preferred_element_type=jnp.float32))

    @pl.when(f == 0)
    def _():
        o_ref[...] = y

    @pl.when(f != 0)
    def _():
        o_ref[...] += y


# --------------------------------------------------------------------------------------
# Planning (all static; hashable -> jit static arg)
# --------------------------------------------------------------------------------------
class _Plan(NamedTuple):
    mode: str
    B: int
    C: int
    T: int
    Tp: int
    Fp: int
    tF: int
    nF: int
    Bt: int
    Bpad: int
    x_dtype: str
    mat_dtype: str
    vmem_limit: int


def _make_plan(B, C, T, compute_dtype, mode="auto", f_blocks=None):
    x_dt = np.dtype(compute_dtype)
    mat_dt = np.dtype(compute_dtype)
    budget = _VMEM_BUDGET
    Tp = _round_up(T, _LANE)
    Fdim = T // 2 + 1
    Fp0 = _round_up(Fdim, _LANE)

    # Batch tile: target Bt*C ~ 1024 MXU rows, bounded by VMEM for the (double-buffered)
    # X tile + f32 out tile. Prefer an even number of batch tiles (v7x 2 TensorCores)
    # unless that would force sub-sublane tiles on a tiny batch.
    per_b = 2 * C * Tp * x_dt.itemsize + 2 * Tp * 4
    bt_cap = min(B, max(1, 1024 // max(C, 1)), max(1, (budget // 4) // per_b))
    nB = _ceil_div(B, bt_cap)
    if nB % 2 and (nB > 1 or B >= 2 * _SUBLANE):
        nB += 1
    Bt = _ceil_div(B, nB)
    if Bt >= _SUBLANE:
        Bt = _round_up(Bt, _SUBLANE)              # sublane-dense input / output tiles
    Bpad = Bt * nB
    xo_bytes = Bt * per_b

    def mats_bytes(nF, folded):
        tF = _round_up(_ceil_div(Fp0, nF), _LANE)
        bufs = 1 if nF == 1 else 2                # untiled single copy vs. double buffer
        per = (2 * C * Tp * tF if folded else 2 * Tp * tF + 2 * C * tF) + 2 * tF * Tp
        return per * mat_dt.itemsize * bufs, tF

    fold_hbm_ok = 2 * C * Tp * Fp0 * mat_dt.itemsize <= 512 * 1024 * 1024
    if mode == "auto":
        candidates = ["fold", "general"] if fold_hbm_ok else ["general"]
    else:
        candidates = [mode]

    max_nf = max(1, _ceil_div(Fp0, _LANE))
    chosen = None
    fallback = None
    for m in candidates:
        for nF in ([f_blocks] if f_blocks else range(1, max_nf + 1)):
            mb, tF = mats_bytes(nF, m == "fold")
            fallback = (m, nF, tF)
            if mb + xo_bytes <= budget:
                chosen = (m, nF, tF)
                break
        if chosen is not None:
            break
    if chosen is None:
        chosen = fallback                          # finest F tiling; let Mosaic arbitrate
    m, nF, tF = chosen
    return _Plan(mode=m, B=B, C=C, T=T, Tp=Tp, Fp=tF * nF, tF=tF, nF=nF,
                 Bt=Bt, Bpad=Bpad, x_dtype=x_dt.name, mat_dtype=mat_dt.name,
                 vmem_limit=budget)


# --------------------------------------------------------------------------------------
# Jitted forward (padding/transpose + pallas_call all inside jit; no per-call retrace)
# --------------------------------------------------------------------------------------
@partial(jax.jit, static_argnums=(0,))
def _forward_jit(plan, x, wr, wi, comb_w, comb_b, fcos, fnsin, icos, insin):
    P = plan
    x_dt = np.dtype(P.x_dtype)
    mat_dt = np.dtype(P.mat_dtype)
    C, T, Tp, Fp = P.C, P.T, P.Tp, P.Fp
    Fdim = T // 2 + 1

    # Fold the 1x1 Conv2d combine over D and the 1/C channel mean into the filters.
    wre = jnp.einsum('d,dcf->cf', comb_w.astype(jnp.float32), wr.astype(jnp.float32)) / C
    wie = jnp.einsum('d,dcf->cf', comb_w.astype(jnp.float32), wi.astype(jnp.float32)) / C
    wre = jnp.pad(wre, ((0, 0), (0, Fp - Fdim)))
    wie = jnp.pad(wie, ((0, 0), (0, Fp - Fdim)))

    # (B,1,T,C) -> (Bpad, C*Tp): batch-major flatten, zero padded, lane-dense.
    X = jnp.transpose(x[:, 0, :, :], (0, 2, 1))                  # (B, C, T)
    X = jnp.pad(X, ((0, P.Bpad - P.B), (0, 0), (0, Tp - T)))
    X = X.reshape(P.Bpad, C * Tp).astype(x_dt)

    if P.mode == "fold":
        # Gr[c*Tp+t, f] = fcos*Wr - fnsin*Wi ; Gi[c*Tp+t, f] = fcos*Wi + fnsin*Wr
        Gr = fcos[None, :, :] * wre[:, None, :] - fnsin[None, :, :] * wie[:, None, :]
        Gi = fcos[None, :, :] * wie[:, None, :] + fnsin[None, :, :] * wre[:, None, :]
        args = (X,
                Gr.reshape(C * Tp, Fp).astype(mat_dt),
                Gi.reshape(C * Tp, Fp).astype(mat_dt),
                icos.astype(mat_dt), insin.astype(mat_dt))
        kernel = _folded_kernel
        mat_shapes = [(C * Tp, P.tF), (C * Tp, P.tF), (P.tF, Tp), (P.tF, Tp)]
        mat_maps = [lambda b, f: (0, f), lambda b, f: (0, f),
                    lambda b, f: (f, 0), lambda b, f: (f, 0)]
    else:
        args = (X, fcos.astype(mat_dt), fnsin.astype(mat_dt),
                wre.astype(jnp.float32), wie.astype(jnp.float32),
                icos.astype(mat_dt), insin.astype(mat_dt))
        kernel = _general_kernel
        mat_shapes = [(Tp, P.tF), (Tp, P.tF), (C, P.tF), (C, P.tF),
                      (P.tF, Tp), (P.tF, Tp)]
        mat_maps = [lambda b, f: (0, f), lambda b, f: (0, f),
                    lambda b, f: (0, f), lambda b, f: (0, f),
                    lambda b, f: (f, 0), lambda b, f: (f, 0)]

    if P.nF == 1:
        # Grid-invariant operands: single VMEM copy, no pipelining / double buffering.
        mat_specs = [pl.BlockSpec(memory_space=pltpu.MemorySpace.VMEM)
                     for _ in mat_shapes]
    else:
        # F-tiled reduction (v7x / large T): matrices blocked along F, double-buffered.
        mat_specs = [pl.BlockSpec(s, m) for s, m in zip(mat_shapes, mat_maps)]

    out = pl.pallas_call(
        kernel,
        out_shape=jax.ShapeDtypeStruct((P.Bpad, Tp), jnp.float32),
        grid_spec=pltpu.PrefetchScalarGridSpec(
            num_scalar_prefetch=0,
            grid=(P.Bpad // P.Bt, P.nF),
            in_specs=[pl.BlockSpec((P.Bt, C * Tp), lambda b, f: (b, 0))] + mat_specs,
            out_specs=pl.BlockSpec((P.Bt, Tp), lambda b, f: (b, 0)),
        ),
        compiler_params=pltpu.CompilerParams(
            dimension_semantics=("parallel", "arbitrary"),
            vmem_limit_bytes=P.vmem_limit,
        ),
    )(*args)

    # Conv bias added once after the channel mean (scalar); slice off padding.
    y = out[:P.B, :T] + comb_b.reshape(1, 1).astype(jnp.float32)
    return y[:, None, :, None]                                   # (B, 1, T, 1)


def freq_branch_forward(x, wr, wi, comb_w, comb_b, *, compute_dtype=jnp.bfloat16,
                        mode="auto", f_blocks=None):
    """x: (B, 1, T, C) as in the PyTorch module. Returns (B, 1, T, 1) float32.

    compute_dtype: MXU dtype (bf16 default; use float32 for large T if accuracy matters).
    mode: "auto" | "fold" | "general".  f_blocks: force the number of F-reduction tiles.
    """
    B, _, T, C = x.shape
    plan = _make_plan(B, C, T, compute_dtype, mode=mode, f_blocks=f_blocks)
    if plan.mode == "fold":
        # Fold in f32 on device; inverse-DFT matrices go straight to the compute dtype.
        fcos, fnsin, _, _ = _dft_matrices_dev(T, plan.Tp, plan.Fp, jnp.float32)
        _, _, icos, insin = _dft_matrices_dev(T, plan.Tp, plan.Fp, plan.mat_dtype)
    else:
        fcos, fnsin, icos, insin = _dft_matrices_dev(T, plan.Tp, plan.Fp, plan.mat_dtype)
    return _forward_jit(plan, x, wr, wi, comb_w, comb_b, fcos, fnsin, icos, insin)


# --------------------------------------------------------------------------------------
# Reference + demo
# --------------------------------------------------------------------------------------
def ref_forward_np(x, wr, wi, comb_w, comb_b):
    """Pure numpy (float64) reference mirroring the PyTorch forward (eval mode)."""
    x = np.asarray(x, np.float64)
    wr = np.asarray(wr, np.float64)
    wi = np.asarray(wi, np.float64)
    comb_w = np.asarray(comb_w, np.float64)
    B, _, T, C = x.shape
    X = np.transpose(x[:, 0], (0, 2, 1))                     # (B, C, T)
    Xf = np.fft.rfft(X, n=T, axis=-1)[:, None]               # (B, 1, C, F)
    Wr, Wi = wr[None], wi[None]                              # (1, D, C, F)
    Yf = (Xf.real * Wr - Xf.imag * Wi) + 1j * (Xf.real * Wi + Xf.imag * Wr)
    y = np.fft.irfft(Yf, n=T, axis=-1)                       # (B, D, C, T)
    y = np.transpose(y, (0, 1, 3, 2))                        # (B, D, T, C)
    yc = np.einsum('bdtc,d->btc', y, comb_w) + comb_b        # (B, T, C)
    return yc.mean(axis=-1, keepdims=True)[:, None]          # (B, 1, T, 1)


if __name__ == "__main__":
    B, C, T, D = 2, 4, 16, 16
    Fdim = T // 2 + 1

    key = jax.random.PRNGKey(0)
    k1, k2, k3, k4, k5 = jax.random.split(key, 5)
    x = jax.random.normal(k1, (B, 1, T, C), dtype=jnp.float32)
    wr = 0.01 * jax.random.normal(k2, (D, C, Fdim), dtype=jnp.float32)
    wi = 0.01 * jax.random.normal(k3, (D, C, Fdim), dtype=jnp.float32)
    # Conv2d(D, 1, kernel_size=1): weight (1, D, 1, 1) -> (D,), bias (1,)
    comb_w = jax.random.normal(k4, (D,), dtype=jnp.float32) / jnp.sqrt(D)
    comb_b = 0.1 * jax.random.normal(k5, (1,), dtype=jnp.float32)

    ref = ref_forward_np(x, wr, wi, comb_w, float(comb_b[0]))

    # 1) f32 matrices, auto plan (folded filters, single F tile): tight numeric check.
    out_f32 = jax.block_until_ready(
        freq_branch_forward(x, wr, wi, comb_w, comb_b, compute_dtype=jnp.float32))
    assert out_f32.shape == (B, 1, T, 1), out_f32.shape
    np.testing.assert_allclose(np.asarray(out_f32), ref, atol=2e-4, rtol=1e-3)

    # 2) default bf16 (MXU-native) path: looser tolerance.
    out_bf16 = jax.block_until_ready(freq_branch_forward(x, wr, wi, comb_w, comb_b))
    assert out_bf16.shape == (B, 1, T, 1), out_bf16.shape
    np.testing.assert_allclose(np.asarray(out_bf16), ref, atol=3e-3, rtol=2e-2)

    # 3) general (un-folded) kernel with a forced 2-tile F reduction: exercises the
    #    v7x large-T path (blocked DFT matrices + output accumulation over grid axis 1).
    out_gen = jax.block_until_ready(
        freq_branch_forward(x, wr, wi, comb_w, comb_b, compute_dtype=jnp.float32,
                            mode="general", f_blocks=2))
    np.testing.assert_allclose(np.asarray(out_gen), ref, atol=2e-4, rtol=1e-3)

    print("KERNEL_OK")
</pallas_src>

<mosaic_0001>
module attributes {stable_mosaic.version = 11 : i64} {
  func.func @_folded_kernel(%arg0: i32, %arg1: i32, %arg2: memref<2x512xf32, #tpu.memory_space<vmem>>, %arg3: memref<512x128xf32, #tpu.memory_space<vmem>>, %arg4: memref<512x128xf32, #tpu.memory_space<vmem>>, %arg5: memref<128x128xf32, #tpu.memory_space<vmem>>, %arg6: memref<128x128xf32, #tpu.memory_space<vmem>>, %arg7: memref<2x128xf32, #tpu.memory_space<vmem>>) attributes {dimension_semantics = [#tpu.dimension_semantics<parallel>, #tpu.dimension_semantics<arbitrary>], iteration_bounds = array<i64: 1, 1>, scalar_prefetch = 0 : i64, scratch_operands = 0 : i64, tpu.core_type = #tpu.core_type<tc>, window_params = [{transform_indices = @transform_0, window_bounds = array<i64: 2, 512>}, {pipeline_mode = #tpu.pipeline_mode<synchronous>, transform_indices = @transform_1, window_bounds = array<i64: 512, 128>}, {pipeline_mode = #tpu.pipeline_mode<synchronous>, transform_indices = @transform_2, window_bounds = array<i64: 512, 128>}, {pipeline_mode = #tpu.pipeline_mode<synchronous>, transform_indices = @transform_3, window_bounds = array<i64: 128, 128>}, {pipeline_mode = #tpu.pipeline_mode<synchronous>, transform_indices = @transform_4, window_bounds = array<i64: 128, 128>}, {transform_indices = @transform_5, window_bounds = array<i64: 2, 128>}]} {
    %c0 = arith.constant 0 : index
    %c0_0 = arith.constant 0 : index
    %0 = vector.load %arg2[%c0, %c0_0] : memref<2x512xf32, #tpu.memory_space<vmem>>, vector<2x512xf32>
    %c0_1 = arith.constant 0 : index
    %c0_2 = arith.constant 0 : index
    %1 = vector.load %arg3[%c0_1, %c0_2] : memref<512x128xf32, #tpu.memory_space<vmem>>, vector<512x128xf32>
    %cst = arith.constant dense<0.000000e+00> : vector<2x128xf32>
    %2 = tpu.matmul %0, %1, %cst {dimension_numbers = #tpu.dot_dimension_numbers<[1], [0], [0], [1], [0, 0, 1, 1], [], []>} : vector<2x512xf32>, vector<512x128xf32>, vector<2x128xf32> -> vector<2x128xf32>
    %c0_3 = arith.constant 0 : index
    %c0_4 = arith.constant 0 : index
    %3 = vector.load %arg4[%c0_3, %c0_4] : memref<512x128xf32, #tpu.memory_space<vmem>>, vector<512x128xf32>
    %cst_5 = arith.constant dense<0.000000e+00> : vector<2x128xf32>
    %4 = tpu.matmul %0, %3, %cst_5 {dimension_numbers = #tpu.dot_dimension_numbers<[1], [0], [0], [1], [0, 0, 1, 1], [], []>} : vector<2x512xf32>, vector<512x128xf32>, vector<2x128xf32> -> vector<2x128xf32>
    %c0_6 = arith.constant 0 : index
    %c0_7 = arith.constant 0 : index
    %5 = vector.load %arg5[%c0_6, %c0_7] : memref<128x128xf32, #tpu.memory_space<vmem>>, vector<128x128xf32>
    %cst_8 = arith.constant dense<0.000000e+00> : vector<2x128xf32>
    %6 = tpu.matmul %2, %5, %cst_8 {dimension_numbers = #tpu.dot_dimension_numbers<[1], [0], [0], [1], [0, 0, 1, 1], [], []>} : vector<2x128xf32>, vector<128x128xf32>, vector<2x128xf32> -> vector<2x128xf32>
    %c0_9 = arith.constant 0 : index
    %c0_10 = arith.constant 0 : index
    %7 = vector.load %arg6[%c0_9, %c0_10] : memref<128x128xf32, #tpu.memory_space<vmem>>, vector<128x128xf32>
    %cst_11 = arith.constant dense<0.000000e+00> : vector<2x128xf32>
    %8 = tpu.matmul %4, %7, %cst_11 {dimension_numbers = #tpu.dot_dimension_numbers<[1], [0], [0], [1], [0, 0, 1, 1], [], []>} : vector<2x128xf32>, vector<128x128xf32>, vector<2x128xf32> -> vector<2x128xf32>
    %9 = arith.addf %6, %8 : vector<2x128xf32>
    %c0_i32 = arith.constant 0 : i32
    %10 = arith.cmpi eq, %arg1, %c0_i32 : i32
    %11 = arith.extui %10 : i1 to i32
    %c0_i32_12 = arith.constant 0 : i32
    %12 = arith.cmpi ne, %11, %c0_i32_12 : i32
    scf.if %12 {
      %c0_15 = arith.constant 0 : index
      %c0_16 = arith.constant 0 : index
      %16 = vector.load %arg7[%c0_15, %c0_16] : memref<2x128xf32, #tpu.memory_space<vmem>>, vector<2x128xf32>
      tpu.vector_store %arg7[%c0_15, %c0_16], %9 {strides = array<i32>} : memref<2x128xf32, #tpu.memory_space<vmem>>, vector<2x128xf32>,
    } else {
    }
    %c0_i32_13 = arith.constant 0 : i32
    %13 = arith.cmpi ne, %arg1, %c0_i32_13 : i32
    %14 = arith.extui %13 : i1 to i32
    %c0_i32_14 = arith.constant 0 : i32
    %15 = arith.cmpi ne, %14, %c0_i32_14 : i32
    scf.if %15 {
      %c0_15 = arith.constant 0 : index
      %c0_16 = arith.constant 0 : index
      %16 = vector.load %arg7[%c0_15, %c0_16] : memref<2x128xf32, #tpu.memory_space<vmem>>, vector<2x128xf32>
      %17 = arith.addf %16, %9 : vector<2x128xf32>
      %c0_17 = arith.constant 0 : index
      %c0_18 = arith.constant 0 : index
      %18 = vector.load %arg7[%c0_17, %c0_18] : memref<2x128xf32, #tpu.memory_space<vmem>>, vector<2x128xf32>
      tpu.vector_store %arg7[%c0_17, %c0_18], %17 {strides = array<i32>} : memref<2x128xf32, #tpu.memory_space<vmem>>, vector<2x128xf32>,
    } else {
    }
    return
  }
  func.func @transform_0(%arg0: i32, %arg1: i32) -> (i32, i32) {
    %c0_i32 = arith.constant 0 : i32
    %c0_i32_0 = arith.constant 0 : i32
    return %arg0, %c0_i32 : i32, i32
  }
  func.func @transform_1(%arg0: i32, %arg1: i32) -> (i32, i32) {
    %c0_i32 = arith.constant 0 : i32
    %c0_i32_0 = arith.constant 0 : i32
    %c0_i32_1 = arith.constant 0 : i32
    return %c0_i32, %c0_i32_0 : i32, i32
  }
  func.func @transform_2(%arg0: i32, %arg1: i32) -> (i32, i32) {
    %c0_i32 = arith.constant 0 : i32
    %c0_i32_0 = arith.constant 0 : i32
    %c0_i32_1 = arith.constant 0 : i32
    return %c0_i32, %c0_i32_0 : i32, i32
  }
  func.func @transform_3(%arg0: i32, %arg1: i32) -> (i32, i32) {
    %c0_i32 = arith.constant 0 : i32
    %c0_i32_0 = arith.constant 0 : i32
    %c0_i32_1 = arith.constant 0 : i32
    return %c0_i32, %c0_i32_0 : i32, i32
  }
  func.func @transform_4(%arg0: i32, %arg1: i32) -> (i32, i32) {
    %c0_i32 = arith.constant 0 : i32
    %c0_i32_0 = arith.constant 0 : i32
    %c0_i32_1 = arith.constant 0 : i32
    return %c0_i32, %c0_i32_0 : i32, i32
  }
  func.func @transform_5(%arg0: i32, %arg1: i32) -> (i32, i32) {
    %c0_i32 = arith.constant 0 : i32
    %c0_i32_0 = arith.constant 0 : i32
    return %arg0, %c0_i32 : i32, i32
  }
}

</mosaic_0001>

<bundles_post_ra>
// kernel: _forward_jit.1
= control target key start
LH: loop header
LB: loop body
LE: loop exit
PB: predicated region body
PF: predicated region fallthrough
CT: control target
= control target key end

     0   :  { %v887_v30 = vmov 1983009808   ;;  %v90_v32 = vlaneseq  ;;  %vm889_vm0 = vmmov 0   ;;  %s1460_s1 = inlined_call_operand.vmem [shape: f32[512,128], index: 1, kind: input, shape index: {}]   ;;  %s1461_s0 = inlined_call_operand.vmem [shape: f32[2,512], index: 0, kind: input, shape index: {}]   ;;  %s1462_s2 = inlined_call_operand.vmem [shape: f32[512,128], index: 2, kind: input, shape index: {}]   ;;  %s1463_s3 = inlined_call_operand.vmem [shape: f32[128,128], index: 3, kind: input, shape index: {}]   ;;  %s1464_s4 = inlined_call_operand.vmem [shape: f32[128,128], index: 4, kind: input, shape index: {}]   ;;  %s1465_s5 = inlined_call_operand.vmem [shape: f32[2,128], index: 5, kind: output, shape index: {}]  }
   0x1   :  { %v52_v0 = vld [vmem:[%s1460_s1 + $0xf8] sm:$0xff]  ;;  %v51_v4 = vld [vmem:[%s1460_s1 + $0xf0] sm:$0xff]  ;;  %v50_v8 = vld [vmem:[%s1460_s1 + $0xe8] sm:$0xff]  ;;  %v88_v31 = vunpack.c.l.s4 %v887_v30 }
   0x2   :  { %v84_v1 = vld [vmem:[%s1460_s1 + $0x1f8] sm:$0xff]  ;;  %639 = vmatprep.subr.mxu0 %v52_v0  ;;  %v83_v5 = vld [vmem:[%s1460_s1 + $0x1f0] sm:$0xff]  ;;  %v82_v9 = vld [vmem:[%s1460_s1 + $0x1e8] sm:$0xff]  ;;  %v91_v42 = vshrl.u32 %v90_v32, 7 }
   0x3   :  { %v36_v2 = vld [vmem:[%s1460_s1 + $0x78] sm:$0xff]  ;;  %674 = vmatprep.subr.mxu1 %v84_v1  ;;  %v35_v6 = vld [vmem:[%s1460_s1 + $0x70] sm:$0xff]  ;;  %v34_v10 = vld [vmem:[%s1460_s1 + $0x68] sm:$0xff]  ;;  %v89_v41 = vunpack.c.0.s8 %v88_v31 }
   0x4   :  { %v68_v3 = vld [vmem:[%s1460_s1 + $0x178] sm:$0xff]  ;;  %640 = vmatpush3.msra.mxu0 %v36_v2  ;;  %v67_v7 = vld [vmem:[%s1460_s1 + $0x170] sm:$0xff]  ;;  %v66_v11 = vld [vmem:[%s1460_s1 + $0x168] sm:$0xff] }
   0x5   :  { %675 = vmatpush3.msra.mxu1 %v68_v3  ;;  %641 = vmatprep.subr.mxu0 %v51_v4  ;;  %v49_v12 = vld [vmem:[%s1460_s1 + $0xe0] sm:$0xff]  ;;  %v48_v16 = vld [vmem:[%s1460_s1 + $0xd8] sm:$0xff]  ;;  %v47_v20 = vld [vmem:[%s1460_s1 + $0xd0] sm:$0xff]  ;;  %v92_v51 = vsub.s32 %v89_v41, %v91_v42 }
   0x6   :  { %676 = vmatprep.subr.mxu1 %v83_v5  ;;  %642 = vmatpush3.msra.mxu0 %v35_v6  ;;  %v81_v13 = vld [vmem:[%s1460_s1 + $0x1e0] sm:$0xff]  ;;  %v80_v17 = vld [vmem:[%s1460_s1 + $0x1d8] sm:$0xff]  ;;  %v79_v21 = vld [vmem:[%s1460_s1 + $0x1d0] sm:$0xff] }
   0x7   :  { %677 = vmatpush3.msra.mxu1 %v67_v7  ;;  %643 = vmatprep.subr.mxu0 %v50_v8  ;;  %v33_v14 = vld [vmem:[%s1460_s1 + $0x60] sm:$0xff]  ;;  %v32_v18 = vld [vmem:[%s1460_s1 + $0x58] sm:$0xff]  ;;  %v31_v22 = vld [vmem:[%s1460_s1 + $0x50] sm:$0xff] }
   0x8   :  { %678 = vmatprep.subr.mxu1 %v82_v9  ;;  %v65_v15 = vld [vmem:[%s1460_s1 + $0x160] sm:$0xff]  ;;  %644 = vmatpush3.msra.mxu0 %v34_v10  ;;  %v64_v19 = vld [vmem:[%s1460_s1 + $0x158] sm:$0xff]  ;;  %v63_v23 = vld [vmem:[%s1460_s1 + $0x150] sm:$0xff] }
   0x9   :  { %679 = vmatpush3.msra.mxu1 %v66_v11  ;;  %645 = vmatprep.subr.mxu0 %v49_v12  ;;  %v46_v24 = vld [vmem:[%s1460_s1 + $0xc8] sm:$0xff]  ;;  %v45_v28 = vld [vmem:[%s1460_s1 + $0xc0] sm:$0xff]  ;;  %v44_v35 = vld [vmem:[%s1460_s1 + $0xb8] sm:$0xff] }
   0xa   :  { %680 = vmatprep.subr.mxu1 %v81_v13  ;;  %646 = vmatpush3.msra.mxu0 %v33_v14  ;;  %v78_v25 = vld [vmem:[%s1460_s1 + $0x1c8] sm:$0xff]  ;;  %v77_v29 = vld [vmem:[%s1460_s1 + $0x1c0] sm:$0xff]  ;;  %v76_v36 = vld [vmem:[%s1460_s1 + $0x1b8] sm:$0xff] }
   0xb   :  { %681 = vmatpush3.msra.mxu1 %v65_v15  ;;  %647 = vmatprep.subr.mxu0 %v48_v16  ;;  %v30_v26 = vld [vmem:[%s1460_s1 + $0x48] sm:$0xff]  ;;  %v29_v33 = vld [vmem:[%s1460_s1 + $0x40] sm:$0xff]  ;;  %v28_v37 = vld [vmem:[%s1460_s1 + $0x38] sm:$0xff] }
   0xc   :  { %682 = vmatprep.subr.mxu1 %v80_v17  ;;  %648 = vmatpush3.msra.mxu0 %v32_v18  ;;  %v62_v27 = vld [vmem:[%s1460_s1 + $0x148] sm:$0xff]  ;;  %v61_v34 = vld [vmem:[%s1460_s1 + $0x140] sm:$0xff]  ;;  %v60_v38 = vld [vmem:[%s1460_s1 + $0x138] sm:$0xff] }
   0xd   :  { %683 = vmatpush3.msra.mxu1 %v64_v19  ;;  %649 = vmatprep.subr.mxu0 %v47_v20  ;;  %v43_v39 = vld [vmem:[%s1460_s1 + $0xb0] sm:$0xff]  ;;  %v42_v45 = vld [vmem:[%s1460_s1 + $0xa8] sm:$0xff]  ;;  %v41_v49 = vld [vmem:[%s1460_s1 + $0xa0] sm:$0xff] }
   0xe   :  { %684 = vmatprep.subr.mxu1 %v79_v21  ;;  %650 = vmatpush3.msra.mxu0 %v31_v22  ;;  %v75_v40 = vld [vmem:[%s1460_s1 + $0x1b0] sm:$0xff]  ;;  %v74_v46 = vld [vmem:[%s1460_s1 + $0x1a8] sm:$0xff]  ;;  %v73_v50 = vld [vmem:[%s1460_s1 + $0x1a0] sm:$0xff] }
   0xf   :  { %685 = vmatpush3.msra.mxu1 %v63_v23  ;;  %651 = vmatprep.subr.mxu0 %v46_v24  ;;  %v27_v43 = vld [vmem:[%s1460_s1 + $0x30] sm:$0xff]  ;;  %v26_v47 = vld [vmem:[%s1460_s1 + $0x28] sm:$0xff]  ;;  %v25_v52 = vld [vmem:[%s1460_s1 + $0x20] sm:$0xff] }
  0x10   :  { %686 = vmatprep.subr.mxu1 %v78_v25  ;;  %652 = vmatpush3.msra.mxu0 %v30_v26  ;;  %v59_v44 = vld [vmem:[%s1460_s1 + $0x130] sm:$0xff]  ;;  %v58_v48 = vld [vmem:[%s1460_s1 + $0x128] sm:$0xff]  ;;  %v57_v53 = vld [vmem:[%s1460_s1 + $0x120] sm:$0xff] }
  0x11   :  { %687 = vmatpush3.msra.mxu1 %v62_v27  ;;  %653 = vmatprep.subr.mxu0 %v45_v28  ;;  %v20_v54 = vld [vmem:[%s1461_s0] sm:$0xff]  ;;  %v40_v55 = vld [vmem:[%s1460_s1 + $0x98] sm:$0xff]  ;;  %v39_v60 = vld [vmem:[%s1460_s1 + $0x90] sm:$0xff] }
  0x12   :  { %688 = vmatprep.subr.mxu1 %v77_v29  ;;  %654 = vmatpush3.msra.mxu0 %v29_v33  ;;  %v72_v56 = vld [vmem:[%s1460_s1 + $0x198] sm:$0xff]  ;;  %v86_v57 = vcombine.high %v20_v54, %v20_v54  ;;  %v71_v61 = vld [vmem:[%s1460_s1 + $0x190] sm:$0xff]  ;;  %v1085_v62 = vrot.slane %v20_v54, %v92_v51  ;;  %v38_v2 = vld [vmem:[%s1460_s1 + $0x88] sm:$0xff] }
  0x13   :  { %689 = vmatpush3.msra.mxu1 %v61_v34  ;;  %655 = vmatprep.subr.mxu0 %v44_v35  ;;  %v24_v58 = vld [vmem:[%s1460_s1 + $0x18] sm:$0xff]  ;;  %v23_v63 = vld [vmem:[%s1460_s1 + $0x10] sm:$0xff]  ;;  %v70_v3 = vld [vmem:[%s1460_s1 + $0x188] sm:$0xff] }
  0x14   :  { %690 = vmatprep.subr.mxu1 %v76_v36  ;;  %656 = vmatpush3.msra.mxu0 %v28_v37  ;;  %v56_v59 = vld [vmem:[%s1460_s1 + $0x118] sm:$0xff]  ;;  %v55_v0 = vld [vmem:[%s1460_s1 + $0x110] sm:$0xff]  ;;  %v1093_v1 = vrot.slane %v86_v57, %v92_v51  ;;  %v22_v4 = vld [vmem:[%s1460_s1 + $0x8] sm:$0xff]  ;;  %v1115_v8 = vcombine.high %v1085_v62, %v1085_v62 }
  0x15   :  { %691 = vmatpush3.msra.mxu1 %v60_v38  ;;  %657 = vmatprep.subr.mxu0 %v43_v39  ;;  %v54_v5 = vld [vmem:[%s1460_s1 + $0x108] sm:$0xff]  ;;  %v37_v6 = vld [vmem:[%s1460_s1 + $0x80] sm:$0xff]  ;;  %v278_v12 = vld [vmem:[%s1462_s2 + $0xf8] sm:$0xff] }
  0x16   :  { %692 = vmatprep.subr.mxu1 %v75_v40  ;;  %658 = vmatpush3.msra.mxu0 %v27_v43  ;;  %v69_v7 = vld [vmem:[%s1460_s1 + $0x180] sm:$0xff]  ;;  %v1122_v10 = vcombine.high %v1093_v1, %v1093_v1  ;;  %v310_v13 = vld [vmem:[%s1462_s2 + $0x1f8] sm:$0xff]  ;;  %v277_v16 = vld [vmem:[%s1462_s2 + $0xf0] sm:$0xff] }
  0x17   :  { %693 = vmatpush3.msra.mxu1 %v59_v44  ;;  %659 = vmatprep.subr.mxu0 %v42_v45  ;;  %v21_v9 = vld [vmem:[%s1460_s1] sm:$0xff]  ;;  %v262_v14 = vld [vmem:[%s1462_s2 + $0x78] sm:$0xff]  ;;  %v309_v17 = vld [vmem:[%s1462_s2 + $0x1f0] sm:$0xff] }
  0x18   :  { %694 = vmatprep.subr.mxu1 %v74_v46  ;;  %660 = vmatpush3.msra.mxu0 %v26_v47  ;;  %v53_v11 = vld [vmem:[%s1460_s1 + $0x100] sm:$0xff]  ;;  %v294_v15 = vld [vmem:[%s1462_s2 + $0x178] sm:$0xff]  ;;  %v261_v18 = vld [vmem:[%s1462_s2 + $0x70] sm:$0xff] }
  0x19   :  { %695 = vmatpush3.msra.mxu1 %v58_v48  ;;  %661 = vmatprep.subr.mxu0 %v41_v49  ;;  %v293_v19 = vld [vmem:[%s1462_s2 + $0x170] sm:$0xff]  ;;  %v276_v20 = vld [vmem:[%s1462_s2 + $0xe8] sm:$0xff]  ;;  %v275_v24 = vld [vmem:[%s1462_s2 + $0xe0] sm:$0xff] }
  0x1a   :  { %696 = vmatprep.subr.mxu1 %v73_v50  ;;  %662 = vmatpush3.msra.mxu0 %v25_v52  ;;  %v308_v21 = vld [vmem:[%s1462_s2 + $0x1e8] sm:$0xff]  ;;  %v307_v25 = vld [vmem:[%s1462_s2 + $0x1e0] sm:$0xff]  ;;  %v274_v28 = vld [vmem:[%s1462_s2 + $0xd8] sm:$0xff] }
  0x1b   :  { %697 = vmatpush3.msra.mxu1 %v57_v53  ;;  %663 = vmatprep.subr.mxu0 %v40_v55  ;;  %v260_v22 = vld [vmem:[%s1462_s2 + $0x68] sm:$0xff]  ;;  %v259_v26 = vld [vmem:[%s1462_s2 + $0x60] sm:$0xff]  ;;  %v306_v29 = vld [vmem:[%s1462_s2 + $0x1d8] sm:$0xff] }
  0x1c   :  { %698 = vmatprep.subr.mxu1 %v72_v56  ;;  %664 = vmatpush3.msra.mxu0 %v24_v58  ;;  %v292_v23 = vld [vmem:[%s1462_s2 + $0x168] sm:$0xff]  ;;  %v291_v27 = vld [vmem:[%s1462_s2 + $0x160] sm:$0xff]  ;;  %v258_v30 = vld [vmem:[%s1462_s2 + $0x58] sm:$0xff] }
  0x1d   :  { %699 = vmatpush3.msra.mxu1 %v56_v59  ;;  %665 = vmatprep.subr.mxu0 %v39_v60  ;;  %v290_v31 = vld [vmem:[%s1462_s2 + $0x158] sm:$0xff]  ;;  %v273_v32 = vld [vmem:[%s1462_s2 + $0xd0] sm:$0xff]  ;;  %v272_v36 = vld [vmem:[%s1462_s2 + $0xc8] sm:$0xff] }
  0x1e   :  { %700 = vmatprep.subr.mxu1 %v71_v61  ;;  %666 = vmatpush3.msra.mxu0 %v23_v63  ;;  %v305_v33 = vld [vmem:[%s1462_s2 + $0x1d0] sm:$0xff]  ;;  %v304_v37 = vld [vmem:[%s1462_s2 + $0x1c8] sm:$0xff]  ;;  %v271_v40 = vld [vmem:[%s1462_s2 + $0xc0] sm:$0xff] }
  0x1f   :  { %701 = vmatpush3.msra.mxu1 %v55_v0  ;;  %667 = vmatprep.subr.mxu0 %v38_v2  ;;  %v257_v34 = vld [vmem:[%s1462_s2 + $0x50] sm:$0xff]  ;;  %v256_v38 = vld [vmem:[%s1462_s2 + $0x48] sm:$0xff]  ;;  %v303_v41 = vld [vmem:[%s1462_s2 + $0x1c0] sm:$0xff] }
  0x20   :  { %702 = vmatprep.subr.mxu1 %v70_v3  ;;  %668 = vmatpush3.msra.mxu0 %v22_v4  ;;  %v289_v35 = vld [vmem:[%s1462_s2 + $0x150] sm:$0xff]  ;;  %v288_v39 = vld [vmem:[%s1462_s2 + $0x148] sm:$0xff]  ;;  %v255_v42 = vld [vmem:[%s1462_s2 + $0x40] sm:$0xff] }
  0x21   :  { %703 = vmatpush3.msra.mxu1 %v54_v5  ;;  %669 = vmatprep.subr.mxu0 %v37_v6  ;;  %v287_v43 = vld [vmem:[%s1462_s2 + $0x140] sm:$0xff]  ;;  %v270_v44 = vld [vmem:[%s1462_s2 + $0xb8] sm:$0xff]  ;;  %v269_v48 = vld [vmem:[%s1462_s2 + $0xb0] sm:$0xff] }
  0x22   :  { %704 = vmatprep.subr.mxu1 %v69_v7  ;;  %670 = vmatpush3.msra.mxu0 %v21_v9  ;;  %v302_v45 = vld [vmem:[%s1462_s2 + $0x1b8] sm:$0xff]  ;;  %v301_v49 = vld [vmem:[%s1462_s2 + $0x1b0] sm:$0xff]  ;;  %v268_v52 = vld [vmem:[%s1462_s2 + $0xa8] sm:$0xff] }
  0x23   :  { %171 = vmatprep.mubr.f32.mxu0 %v1115_v8  ;;  %705 = vmatpush3.msra.mxu1 %v53_v11  ;;  %v254_v46 = vld [vmem:[%s1462_s2 + $0x38] sm:$0xff]  ;;  %v253_v50 = vld [vmem:[%s1462_s2 + $0x30] sm:$0xff]  ;;  %v300_v53 = vld [vmem:[%s1462_s2 + $0x1a8] sm:$0xff] }
  0x24   :  { %241 = vmatprep.mubr.f32.mxu1 %v1122_v10  ;;  %172 = vmatmul.mubr.f32.vlgmr.msra.gmra.mxu0 %v1085_v62  ;;  %v286_v47 = vld [vmem:[%s1462_s2 + $0x138] sm:$0xff]  ;;  %v285_v51 = vld [vmem:[%s1462_s2 + $0x130] sm:$0xff]  ;;  %v252_v54 = vld [vmem:[%s1462_s2 + $0x28] sm:$0xff] }
  0x25   :  { %242 = vmatmul.mubr.f32.vlgmr.msra.gmra.mxu1 %v1093_v1  ;;  %709 = vmatprep.subr.mxu0 %v278_v12  ;;  %v284_v55 = vld [vmem:[%s1462_s2 + $0x128] sm:$0xff]  ;;  %v267_v56 = vld [vmem:[%s1462_s2 + $0xa0] sm:$0xff]  ;;  %v266_v60 = vld [vmem:[%s1462_s2 + $0x98] sm:$0xff] }
  0x26   :  { %744 = vmatprep.subr.mxu1 %v310_v13  ;;  %710 = vmatpush3.msra.mxu0 %v262_v14  ;;  %v299_v57 = vld [vmem:[%s1462_s2 + $0x1a0] sm:$0xff]  ;;  %v298_v61 = vld [vmem:[%s1462_s2 + $0x198] sm:$0xff]  ;;  %v265_v2 = vld [vmem:[%s1462_s2 + $0x90] sm:$0xff] }
  0x27   :  { %745 = vmatpush3.msra.mxu1 %v294_v15  ;;  %711 = vmatprep.subr.mxu0 %v277_v16  ;;  %v251_v58 = vld [vmem:[%s1462_s2 + $0x20] sm:$0xff]  ;;  %v250_v63 = vld [vmem:[%s1462_s2 + $0x18] sm:$0xff]  ;;  %v297_v3 = vld [vmem:[%s1462_s2 + $0x190] sm:$0xff] }
  0x28   :  { %746 = vmatprep.subr.mxu1 %v309_v17  ;;  %712 = vmatpush3.msra.mxu0 %v261_v18  ;;  %v283_v59 = vld [vmem:[%s1462_s2 + $0x120] sm:$0xff]  ;;  %v282_v0 = vld [vmem:[%s1462_s2 + $0x118] sm:$0xff]  ;;  %v249_v4 = vld [vmem:[%s1462_s2 + $0x10] sm:$0xff]  ;;  %v888_v17 = vmov 0.0  }
  0x29   :  { %747 = vmatpush3.msra.mxu1 %v293_v19  ;;  %713 = vmatprep.subr.mxu0 %v276_v20  ;;  %v281_v5 = vld [vmem:[%s1462_s2 + $0x110] sm:$0xff]  ;;  %v264_v6 = vld [vmem:[%s1462_s2 + $0x88] sm:$0xff]  ;;  %v263_v12 = vld [vmem:[%s1462_s2 + $0x80] sm:$0xff] }
  0x2a   :  { %748 = vmatprep.subr.mxu1 %v308_v21  ;;  %714 = vmatpush3.msra.mxu0 %v260_v22  ;;  %v296_v7 = vld [vmem:[%s1462_s2 + $0x188] sm:$0xff]  ;;  %v295_v13 = vld [vmem:[%s1462_s2 + $0x180] sm:$0xff]  ;;  %v466_v16 = vld [vmem:[%s1463_s3 + $0x78] sm:$0xff] }
  0x2b   :  { %749 = vmatpush3.msra.mxu1 %v292_v23  ;;  %715 = vmatprep.subr.mxu0 %v275_v24  ;;  %v248_v9 = vld [vmem:[%s1462_s2 + $0x8] sm:$0xff]  ;;  %v247_v14 = vld [vmem:[%s1462_s2] sm:$0xff]  ;;  %v465_v18 = vld [vmem:[%s1463_s3 + $0x70] sm:$0xff] }
  0x2c   :  { %750 = vmatprep.subr.mxu1 %v307_v25  ;;  %716 = vmatpush3.msra.mxu0 %v259_v26  ;;  %v280_v11 = vld [vmem:[%s1462_s2 + $0x108] sm:$0xff]  ;;  %v279_v15 = vld [vmem:[%s1462_s2 + $0x100] sm:$0xff]  ;;  %v458_v21 = vld [vmem:[%s1463_s3 + $0x38] sm:$0xff] }
  0x2d   :  { %751 = vmatpush3.msra.mxu1 %v291_v27  ;;  %717 = vmatprep.subr.mxu0 %v274_v28  ;;  %v460_v19 = vld [vmem:[%s1463_s3 + $0x48] sm:$0xff]  ;;  %v459_v20 = vld [vmem:[%s1463_s3 + $0x40] sm:$0xff]  ;;  %v457_v22 = vld [vmem:[%s1463_s3 + $0x30] sm:$0xff] }
  0x2e   :  { %752 = vmatprep.subr.mxu1 %v306_v29  ;;  %718 = vmatpush3.msra.mxu0 %v258_v30  ;;  %v456_v23 = vld [vmem:[%s1463_s3 + $0x28] sm:$0xff]  ;;  %v455_v24 = vld [vmem:[%s1463_s3 + $0x20] sm:$0xff]  ;;  %v454_v25 = vld [vmem:[%s1463_s3 + $0x18] sm:$0xff] }
  0x2f   :  { %753 = vmatpush3.msra.mxu1 %v290_v31  ;;  %719 = vmatprep.subr.mxu0 %v273_v32  ;;  %v453_v26 = vld [vmem:[%s1463_s3 + $0x10] sm:$0xff]  ;;  %v452_v27 = vld [vmem:[%s1463_s3 + $0x8] sm:$0xff]  ;;  %v451_v28 = vld [vmem:[%s1463_s3] sm:$0xff] }
  0x30   :  { %754 = vmatprep.subr.mxu1 %v305_v33  ;;  %720 = vmatpush3.msra.mxu0 %v257_v34  ;;  %v482_v29 = vld [vmem:[%s1464_s4 + $0x78] sm:$0xff]  ;;  %v481_v30 = vld [vmem:[%s1464_s4 + $0x70] sm:$0xff]  ;;  %v480_v31 = vld [vmem:[%s1464_s4 + $0x68] sm:$0xff] }
  0x31   :  { %755 = vmatpush3.msra.mxu1 %v289_v35  ;;  %721 = vmatprep.subr.mxu0 %v272_v36  ;;  %v479_v32 = vld [vmem:[%s1464_s4 + $0x60] sm:$0xff]  ;;  %v478_v33 = vld [vmem:[%s1464_s4 + $0x58] sm:$0xff]  ;;  %v477_v34 = vld [vmem:[%s1464_s4 + $0x50] sm:$0xff] }
  0x32   :  { %756 = vmatprep.subr.mxu1 %v304_v37  ;;  %722 = vmatpush3.msra.mxu0 %v256_v38  ;;  %v476_v35 = vld [vmem:[%s1464_s4 + $0x48] sm:$0xff]  ;;  %v475_v36 = vld [vmem:[%s1464_s4 + $0x40] sm:$0xff]  ;;  %v474_v37 = vld [vmem:[%s1464_s4 + $0x38] sm:$0xff] }
  0x33   :  { %757 = vmatpush3.msra.mxu1 %v288_v39  ;;  %723 = vmatprep.subr.mxu0 %v271_v40  ;;  %v473_v38 = vld [vmem:[%s1464_s4 + $0x30] sm:$0xff]  ;;  %v472_v39 = vld [vmem:[%s1464_s4 + $0x28] sm:$0xff]  ;;  %v471_v40 = vld [vmem:[%s1464_s4 + $0x20] sm:$0xff] }
  0x34   :  { %758 = vmatprep.subr.mxu1 %v303_v41  ;;  %724 = vmatpush3.msra.mxu0 %v255_v42  ;;  %v470_v41 = vld [vmem:[%s1464_s4 + $0x18] sm:$0xff]  ;;  %v469_v42 = vld [vmem:[%s1464_s4 + $0x10] sm:$0xff] }
  0x35   :  { %759 = vmatpush3.msra.mxu1 %v287_v43  ;;  %725 = vmatprep.subr.mxu0 %v270_v44  ;;  %v468_v43 = vld [vmem:[%s1464_s4 + $0x8] sm:$0xff]  ;;  %v467_v44 = vld [vmem:[%s1464_s4] sm:$0xff] }
  0x36   :  { %760 = vmatprep.subr.mxu1 %v302_v45  ;;  %726 = vmatpush3.msra.mxu0 %v254_v46 }
  0x37   :  { %761 = vmatpush3.msra.mxu1 %v286_v47  ;;  %727 = vmatprep.subr.mxu0 %v269_v48 }
  0x38   :  { %762 = vmatprep.subr.mxu1 %v301_v49  ;;  %728 = vmatpush3.msra.mxu0 %v253_v50 }
  0x39   :  { %763 = vmatpush3.msra.mxu1 %v285_v51  ;;  %729 = vmatprep.subr.mxu0 %v268_v52 }
  0x3a   :  { %764 = vmatprep.subr.mxu1 %v300_v53  ;;  %730 = vmatpush3.msra.mxu0 %v252_v54 }
  0x3b   :  { %765 = vmatpush3.msra.mxu1 %v284_v55  ;;  %731 = vmatprep.subr.mxu0 %v267_v56 }
  0x3c   :  { %766 = vmatprep.subr.mxu1 %v299_v57  ;;  %732 = vmatpush3.msra.mxu0 %v251_v58 }
  0x3d   :  { %767 = vmatpush3.msra.mxu1 %v283_v59  ;;  %733 = vmatprep.subr.mxu0 %v266_v60 }
  0x3e   :  { %768 = vmatprep.subr.mxu1 %v298_v61  ;;  %734 = vmatpush3.msra.mxu0 %v250_v63 }
  0x3f   :  { %769 = vmatpush3.msra.mxu1 %v282_v0  ;;  %735 = vmatprep.subr.mxu0 %v265_v2 }
  0x40   :  { %770 = vmatprep.subr.mxu1 %v297_v3  ;;  %736 = vmatpush3.msra.mxu0 %v249_v4 }
  0x41   :  { %771 = vmatpush3.msra.mxu1 %v281_v5  ;;  %737 = vmatprep.subr.mxu0 %v264_v6 }
  0x42   :  { %772 = vmatprep.subr.mxu1 %v296_v7  ;;  %738 = vmatpush3.msra.mxu0 %v248_v9 }
  0x43   :  { %773 = vmatpush3.msra.mxu1 %v280_v11  ;;  %739 = vmatprep.subr.mxu0 %v263_v12 }
  0x44   :  { %774 = vmatprep.subr.mxu1 %v295_v13  ;;  %740 = vmatpush3.msra.mxu0 %v247_v14 }
  0x45   :  { %375 = vmatprep.mubr.f32.mxu0 %v1115_v8  ;;  %775 = vmatpush3.msra.mxu1 %v279_v15  ;;  %v464_v8 = vld [vmem:[%s1463_s3 + $0x68] sm:$0xff] }
  0x46   :  { %445 = vmatprep.mubr.f32.mxu1 %v1122_v10  ;;  %376 = vmatmul.mubr.f32.vlgmr.msra.gmra.mxu0 %v1085_v62  ;;  %v463_v62 = vld [vmem:[%s1463_s3 + $0x60] sm:$0xff]  ;;  %v461_v10 = vld [vmem:[%s1463_s3 + $0x50] sm:$0xff] }
  0x47   :  { %446 = vmatmul.mubr.f32.vlgmr.msra.gmra.mxu1 %v1093_v1  ;;  %848 = vmatprep.subr.mxu1 %v888_v17  ;;  %v462_v1 = vld [vmem:[%s1463_s3 + $0x58] sm:$0xff] }
  0x48   :  { %813 = vmatprep.subr.mxu0 %v888_v17  ;;  %849 = vmatpush3.msra.mxu1 %v466_v16 }
  0x49   :  { %850 = vmatprep.subr.mxu1 %v888_v17  ;;  %880 = vmatprep.mubr.msk.f32.mxu1 %vm889_vm0, %v888_v17 }
  0x4a   :  { %851 = vmatpush3.msra.mxu1 %v465_v18  ;;  %845 = vmatprep.mubr.msk.f32.mxu0 %vm889_vm0, %v888_v17 }
  0x4b   :  { %852 = vmatprep.subr.mxu1 %v888_v17  ;;  %814 = vmatpush3.msra.mxu0 %v482_v29 }
  0x4c   :  { %853 = vmatpush3.msra.mxu1 %v464_v8  ;;  %815 = vmatprep.subr.mxu0 %v888_v17 }
  0x4d   :  { %854 = vmatprep.subr.mxu1 %v888_v17  ;;  %816 = vmatpush3.msra.mxu0 %v481_v30 }
  0x4e   :  { %855 = vmatpush3.msra.mxu1 %v463_v62  ;;  %817 = vmatprep.subr.mxu0 %v888_v17 }
  0x4f   :  { %856 = vmatprep.subr.mxu1 %v888_v17  ;;  %818 = vmatpush3.msra.mxu0 %v480_v31 }
  0x50   :  { %857 = vmatpush3.msra.mxu1 %v462_v1  ;;  %819 = vmatprep.subr.mxu0 %v888_v17 }
  0x51   :  { %858 = vmatprep.subr.mxu1 %v888_v17  ;;  %820 = vmatpush3.msra.mxu0 %v479_v32 }
  0x52   :  { %859 = vmatpush3.msra.mxu1 %v461_v10  ;;  %821 = vmatprep.subr.mxu0 %v888_v17 }
  0x53   :  { %860 = vmatprep.subr.mxu1 %v888_v17  ;;  %822 = vmatpush3.msra.mxu0 %v478_v33 }
  0x54   :  { %861 = vmatpush3.msra.mxu1 %v460_v19  ;;  %823 = vmatprep.subr.mxu0 %v888_v17 }
  0x55   :  { %862 = vmatprep.subr.mxu1 %v888_v17  ;;  %824 = vmatpush3.msra.mxu0 %v477_v34 }
  0x56   :  { %863 = vmatpush3.msra.mxu1 %v459_v20  ;;  %825 = vmatprep.subr.mxu0 %v888_v17 }
  0x57   :  { %864 = vmatprep.subr.mxu1 %v888_v17  ;;  %826 = vmatpush3.msra.mxu0 %v476_v35 }
  0x58   :  { %865 = vmatpush3.msra.mxu1 %v458_v21  ;;  %827 = vmatprep.subr.mxu0 %v888_v17 }
  0x59   :  { %866 = vmatprep.subr.mxu1 %v888_v17  ;;  %828 = vmatpush3.msra.mxu0 %v475_v36 }
  0x5a   :  { %867 = vmatpush3.msra.mxu1 %v457_v22  ;;  %829 = vmatprep.subr.mxu0 %v888_v17 }
  0x5b   :  { %868 = vmatprep.subr.mxu1 %v888_v17  ;;  %830 = vmatpush3.msra.mxu0 %v474_v37 }
  0x5c   :  { %869 = vmatpush3.msra.mxu1 %v456_v23  ;;  %831 = vmatprep.subr.mxu0 %v888_v17 }
  0x5d   :  { %870 = vmatprep.subr.mxu1 %v888_v17  ;;  %832 = vmatpush3.msra.mxu0 %v473_v38 }
  0x5e   :  { %871 = vmatpush3.msra.mxu1 %v455_v24  ;;  %833 = vmatprep.subr.mxu0 %v888_v17 }
  0x5f   :  { %872 = vmatprep.subr.mxu1 %v888_v17  ;;  %834 = vmatpush3.msra.mxu0 %v472_v39 }
  0x60   :  { %873 = vmatpush3.msra.mxu1 %v454_v25  ;;  %835 = vmatprep.subr.mxu0 %v888_v17 }
  0x61   :  { %874 = vmatprep.subr.mxu1 %v888_v17  ;;  %836 = vmatpush3.msra.mxu0 %v471_v40 }
  0x62   :  { %875 = vmatpush3.msra.mxu1 %v453_v26  ;;  %837 = vmatprep.subr.mxu0 %v888_v17 }
  0x63   :  { %876 = vmatprep.subr.mxu1 %v888_v17  ;;  %838 = vmatpush3.msra.mxu0 %v470_v41 }
  0x64   :  { %877 = vmatpush3.msra.mxu1 %v452_v27  ;;  %839 = vmatprep.subr.mxu0 %v888_v17 }
  0x65   :  { %878 = vmatprep.subr.mxu1 %v888_v17  ;;  %840 = vmatpush3.msra.mxu0 %v469_v42 }
  0x66   :  { %879 = vmatpush3.msra.mxu1 %v451_v28  ;;  %841 = vmatprep.subr.mxu0 %v888_v17 }
  0x67   :  { %842 = vmatpush3.msra.mxu0 %v468_v43 }
  0x68   :  { %843 = vmatprep.subr.mxu0 %v888_v17 }
  0x69   :  { %844 = vmatpush3.msra.mxu0 %v467_v44 }
  0xe4   :  { %v671_v45 = vpop.f32.mrf.mxu0 }
  0xe5   :  { %v706_v46 = vpop.f32.mrf.mxu1 }
  0xe6   :  { %v672_v47 = vpop.f32.mrf.mxu0 }
  0xe7   :  { %v707_v48 = vpop.f32.mrf.mxu1  ;;  %v673_v49 = vadd.f32 %v672_v47, %v671_v45 }
  0xe8   :  { %v708_v50 = vadd.f32 %v707_v48, %v706_v46 }
  0xea   :  { %v244_v51 = vadd.f32 %v708_v50, %v673_v49 }
  0xec   :  { %881 = vmatmul.mubr.f32.vlgmr.msra.gmra.mxu1 %v244_v51 }
 0x106   :  { %v741_v52 = vpop.f32.mrf.mxu0 }
 0x107   :  { %v776_v53 = vpop.f32.mrf.mxu1 }
 0x108   :  { %v742_v54 = vpop.f32.mrf.mxu0 }
 0x109   :  { %v777_v55 = vpop.f32.mrf.mxu1  ;;  %v743_v56 = vadd.f32 %v742_v54, %v741_v52 }
 0x10a   :  { %v778_v57 = vadd.f32 %v777_v55, %v776_v53 }
 0x10c   :  { %v448_v58 = vadd.f32 %v778_v57, %v743_v56 }
 0x10e   :  { %846 = vmatmul.mubr.f32.vlgmr.msra.gmra.mxu0 %v448_v58 }
 0x1ac   :  { %v619_v59 = vpop.f32.mrf.mxu1 }
 0x1ae   :  { %v882_v60 = vpop.f32.mrf.mxu1 }
 0x1ce   :  { %v549_v61 = vpop.f32.mrf.mxu0 }
 0x1cf   :  { %v620_v63 = vadd.f32 %v619_v59, %v549_v61 }
 0x1d0   :  { %v847_v0 = vpop.f32.mrf.mxu0 }
 0x1d1   :  { %627 = vst [vmem:[%s1465_s5] sm:$0x3] %v620_v63 }

</bundles_post_ra>
